<compile_context>
chip_gen: v7x
topology: tpu7x:2x2x1
jax: 0.10.0
libtpu: 0.0.40
codegen_flags: <defaults>
</compile_context>

<pallas_src>
import functools

import jax
import jax.numpy as jnp
from jax.experimental import pallas as pl
from jax.experimental.pallas import tpu as pltpu

LANE = 128     # vreg lane width
SUBLANE = 8    # f32 sublane count


def _round_up(x, m):
    return (x + m - 1) // m * m


def bert_spc_kernel(txt_ref, seg_ref, emb_ref, wp_ref, bp_ref, wd_ref, bd_ref,
                    out_ref, *, seq_len):
    """Fused embedding-gather + mean + BERT pooler + classifier head.

    txt_ref : [TB, S]   int32 token ids (batch tile)
    seg_ref : [TB, S]   int32 segment ids, pre-offset by vocab size
    emb_ref : [VT, D]   bf16 combined (token ++ segment) embedding table
    wp_ref  : [D, D]    bf16 pooler weight
    bp_ref  : [1, D]    f32  pooler bias
    wd_ref  : [D, PP]   bf16 classifier weight (lane-padded)
    bd_ref  : [1, PP]   f32  classifier bias   (lane-padded)
    out_ref : [TB, PP]  f32  logits            (lane-padded)
    """
    TB = txt_ref.shape[0]
    VT = emb_ref.shape[0]

    # ---- embedding gather + mean over the sequence, done on the MXU --------
    # counts[b, v] = (#{s: txt[b,s]==v} + #{s: seg[b,s]==v}) / S ;  h = counts @ E
    lane_ids = jax.lax.broadcasted_iota(jnp.int32, (TB, VT), 1)
    counts = jnp.zeros((TB, VT), jnp.float32)
    for s in range(seq_len):                      # static unroll, S is small here
        t = txt_ref[:, s:s + 1]                   # [TB, 1] int32
        g = seg_ref[:, s:s + 1]                   # [TB, 1] int32 (already offset)
        counts += (lane_ids == t).astype(jnp.float32)
        counts += (lane_ids == g).astype(jnp.float32)
    counts *= jnp.float32(1.0 / seq_len)          # exact in bf16 (S power of two)
    # TODO(synk): for realistic vocab sizes (30K+) replace the one-hot matmul with a
    #             DMA row-gather (pl.Element index_map / make_async_copy per page).

    h = jnp.dot(counts.astype(jnp.bfloat16), emb_ref[...],
                preferred_element_type=jnp.float32)               # [TB, D] f32

    # ---- BERT pooler: tanh(h @ Wp + bp) -> "pooled_output" -----------------
    pooled = jnp.tanh(
        jnp.dot(h.astype(jnp.bfloat16), wp_ref[...],
                preferred_element_type=jnp.float32) + bp_ref[...])

    # nn.Dropout in eval mode is the identity.
    # TODO(synk): training-mode dropout (pltpu.prng_random_bits mask) not implemented.

    # ---- classifier head: pooled @ Wd + bd ----------------------------------
    logits = jnp.dot(pooled.astype(jnp.bfloat16), wd_ref[...],
                     preferred_element_type=jnp.float32) + bd_ref[...]
    out_ref[...] = logits                                         # f32, lane-dense


def bert_spc_forward(txt_ids, segment_ids, params, *, batch_tile=SUBLANE):
    """Full BERT_SPC.forward: single fused Pallas pass over the embedding rows."""
    tok_emb = params["tok_emb"]            # [V, D] f32
    seg_emb = params["seg_emb"]            # [2, D] f32
    wp, bp = params["wp"], params["bp"]    # [D, D], [1, D]
    wd, bd = params["wd"], params["bd"]    # [D, P], [1, P]

    B, S = txt_ids.shape
    V, D = tok_emb.shape
    P = wd.shape[1]
    assert D % LANE == 0, "bert_dim must be a multiple of 128 (true for 128/768/1024)"

    # ---- host-side layout prep: padding + bf16 MXU operands ----------------
    TB = batch_tile
    B_pad = _round_up(max(B, TB), TB)                 # sublane/tile aligned batch
    P_pad = _round_up(P, LANE)                        # lane-dense output
    VT = _round_up(V + seg_emb.shape[0], LANE)        # combined table rows

    txt_p = jnp.zeros((B_pad, S), jnp.int32).at[:B].set(txt_ids.astype(jnp.int32))
    seg_p = jnp.zeros((B_pad, S), jnp.int32).at[:B].set(
        segment_ids.astype(jnp.int32) + V)            # offset into combined table

    emb = jnp.zeros((VT, D), jnp.float32)
    emb = emb.at[:V].set(tok_emb).at[V:V + seg_emb.shape[0]].set(seg_emb)
    emb = emb.astype(jnp.bfloat16)

    wp_b = wp.astype(jnp.bfloat16)
    wd_p = jnp.zeros((D, P_pad), jnp.float32).at[:, :P].set(wd).astype(jnp.bfloat16)
    bd_p = jnp.zeros((1, P_pad), jnp.float32).at[:, :P].set(bd)

    grid = (B_pad // TB,)

    logits_pad = pl.pallas_call(
        functools.partial(bert_spc_kernel, seq_len=S),
        out_shape=jax.ShapeDtypeStruct((B_pad, P_pad), jnp.float32),
        grid=grid,
        in_specs=[
            pl.BlockSpec((TB, S), lambda i: (i, 0)),       # token ids   (batch-tiled)
            pl.BlockSpec((TB, S), lambda i: (i, 0)),       # segment ids (batch-tiled)
            pl.BlockSpec((VT, D), lambda i: (0, 0)),       # emb table   (resident)
            pl.BlockSpec((D, D), lambda i: (0, 0)),        # Wp          (resident)
            pl.BlockSpec((1, D), lambda i: (0, 0)),        # bp
            pl.BlockSpec((D, P_pad), lambda i: (0, 0)),    # Wd          (resident)
            pl.BlockSpec((1, P_pad), lambda i: (0, 0)),    # bd
        ],
        out_specs=pl.BlockSpec((TB, P_pad), lambda i: (i, 0)),
        compiler_params=pltpu.CompilerParams(
            dimension_semantics=("parallel",),             # shard batch across TCs
        ),
    )(txt_p, seg_p, emb, wp_b, bp, wd_p, bd_p)

    return logits_pad[:B, :P]


def init_params(key, vocab=64, bert_dim=128, polarities_dim=3):
    k1, k2, k3, k4, k5, k6 = jax.random.split(key, 6)
    scale = 0.02
    return {
        "tok_emb": scale * jax.random.normal(k1, (vocab, bert_dim), jnp.float32),
        "seg_emb": scale * jax.random.normal(k2, (2, bert_dim), jnp.float32),
        "wp": scale * jax.random.normal(k3, (bert_dim, bert_dim), jnp.float32),
        "bp": scale * jax.random.normal(k4, (1, bert_dim), jnp.float32),
        "wd": scale * jax.random.normal(k5, (bert_dim, polarities_dim), jnp.float32),
        "bd": scale * jax.random.normal(k6, (1, polarities_dim), jnp.float32),
    }


if __name__ == "__main__":
    key = jax.random.PRNGKey(0)
    kp, kt, ks = jax.random.split(key, 3)

    # Small but tiling-exercising shapes: batch pads 12 -> 16 (two batch tiles),
    # D=128 lane-aligned, P pads 3 -> 128 inside the call.
    batch, seq, vocab, bert_dim, polarities_dim = 12, 8, 64, 128, 3
    params = init_params(kp, vocab=vocab, bert_dim=bert_dim,
                         polarities_dim=polarities_dim)

    txt_ids = jax.random.randint(kt, (batch, seq), 0, vocab, dtype=jnp.int32)
    segment_ids = jax.random.randint(ks, (batch, seq), 0, 2, dtype=jnp.int32)

    logits = bert_spc_forward(txt_ids, segment_ids, params)
    jax.block_until_ready(logits)

    # Pure-JAX reference mirroring the kernel's bf16 MXU-operand casts.
    emb_ref = jnp.concatenate([params["tok_emb"], params["seg_emb"]], axis=0)
    emb_ref = emb_ref.astype(jnp.bfloat16).astype(jnp.float32)
    wp_ref = params["wp"].astype(jnp.bfloat16).astype(jnp.float32)
    wd_ref = params["wd"].astype(jnp.bfloat16).astype(jnp.float32)
    h = emb_ref[txt_ids] + emb_ref[segment_ids + vocab]       # [B, S, D]
    h = jnp.mean(h, axis=1)                                   # [B, D]
    h = h.astype(jnp.bfloat16).astype(jnp.float32)
    pooled = jnp.tanh(h @ wp_ref + params["bp"])
    pooled = pooled.astype(jnp.bfloat16).astype(jnp.float32)
    ref = pooled @ wd_ref + params["bd"]

    assert logits.shape == (batch, polarities_dim)
    max_err = float(jnp.max(jnp.abs(logits - ref)))
    assert jnp.allclose(logits, ref, atol=1e-3, rtol=1e-2), max_err

    print("KERNEL_OK")
</pallas_src>

<mosaic_0001>
module attributes {stable_mosaic.version = 11 : i64} {
  func.func @bert_spc_kernel(%arg0: i32, %arg1: memref<8x8xi32, #tpu.memory_space<vmem>>, %arg2: memref<8x8xi32, #tpu.memory_space<vmem>>, %arg3: memref<128x128xbf16, #tpu.memory_space<vmem>>, %arg4: memref<128x128xbf16, #tpu.memory_space<vmem>>, %arg5: memref<1x128xf32, #tpu.memory_space<vmem>>, %arg6: memref<128x128xbf16, #tpu.memory_space<vmem>>, %arg7: memref<1x128xf32, #tpu.memory_space<vmem>>, %arg8: memref<8x128xf32, #tpu.memory_space<vmem>>) attributes {dimension_semantics = [#tpu.dimension_semantics<parallel>], iteration_bounds = array<i64: 2>, scalar_prefetch = 0 : i64, scratch_operands = 0 : i64, tpu.core_type = #tpu.core_type<tc>, window_params = [{transform_indices = @transform_0, window_bounds = array<i64: 8, 8>}, {transform_indices = @transform_1, window_bounds = array<i64: 8, 8>}, {pipeline_mode = #tpu.pipeline_mode<synchronous>, transform_indices = @transform_2, window_bounds = array<i64: 128, 128>}, {pipeline_mode = #tpu.pipeline_mode<synchronous>, transform_indices = @transform_3, window_bounds = array<i64: 128, 128>}, {pipeline_mode = #tpu.pipeline_mode<synchronous>, transform_indices = @transform_4, window_bounds = array<i64: 1, 128>}, {pipeline_mode = #tpu.pipeline_mode<synchronous>, transform_indices = @transform_5, window_bounds = array<i64: 128, 128>}, {pipeline_mode = #tpu.pipeline_mode<synchronous>, transform_indices = @transform_6, window_bounds = array<i64: 1, 128>}, {transform_indices = @transform_7, window_bounds = array<i64: 8, 128>}]} {
    %0 = tpu.iota {dimensions = array<i32: 1>} : vector<8x128xi32>
    %cst = arith.constant 0.000000e+00 : f32
    %1 = vector.broadcast %cst : f32 to vector<8x128xf32>
    %c0 = arith.constant 0 : index
    %c0_0 = arith.constant 0 : index
    %2 = vector.load %arg1[%c0, %c0_0] : memref<8x8xi32, #tpu.memory_space<vmem>>, vector<8x1xi32>
    %c0_1 = arith.constant 0 : index
    %c0_2 = arith.constant 0 : index
    %3 = vector.load %arg2[%c0_1, %c0_2] : memref<8x8xi32, #tpu.memory_space<vmem>>, vector<8x1xi32>
    %4 = vector.broadcast %2 : vector<8x1xi32> to vector<8x128xi32>
    %5 = arith.cmpi eq, %0, %4 : vector<8x128xi32>
    %6 = arith.extui %5 : vector<8x128xi1> to vector<8x128xi32>
    %7 = arith.sitofp %6 : vector<8x128xi32> to vector<8x128xf32>
    %8 = arith.addf %1, %7 : vector<8x128xf32>
    %9 = vector.broadcast %3 : vector<8x1xi32> to vector<8x128xi32>
    %10 = arith.cmpi eq, %0, %9 : vector<8x128xi32>
    %11 = arith.extui %10 : vector<8x128xi1> to vector<8x128xi32>
    %12 = arith.sitofp %11 : vector<8x128xi32> to vector<8x128xf32>
    %13 = arith.addf %8, %12 : vector<8x128xf32>
    %c0_3 = arith.constant 0 : index
    %c1 = arith.constant 1 : index
    %14 = vector.load %arg1[%c0_3, %c1] : memref<8x8xi32, #tpu.memory_space<vmem>>, vector<8x1xi32>
    %c0_4 = arith.constant 0 : index
    %c1_5 = arith.constant 1 : index
    %15 = vector.load %arg2[%c0_4, %c1_5] : memref<8x8xi32, #tpu.memory_space<vmem>>, vector<8x1xi32>
    %16 = vector.broadcast %14 : vector<8x1xi32> to vector<8x128xi32>
    %17 = arith.cmpi eq, %0, %16 : vector<8x128xi32>
    %18 = arith.extui %17 : vector<8x128xi1> to vector<8x128xi32>
    %19 = arith.sitofp %18 : vector<8x128xi32> to vector<8x128xf32>
    %20 = arith.addf %13, %19 : vector<8x128xf32>
    %21 = vector.broadcast %15 : vector<8x1xi32> to vector<8x128xi32>
    %22 = arith.cmpi eq, %0, %21 : vector<8x128xi32>
    %23 = arith.extui %22 : vector<8x128xi1> to vector<8x128xi32>
    %24 = arith.sitofp %23 : vector<8x128xi32> to vector<8x128xf32>
    %25 = arith.addf %20, %24 : vector<8x128xf32>
    %c0_6 = arith.constant 0 : index
    %c2 = arith.constant 2 : index
    %26 = vector.load %arg1[%c0_6, %c2] : memref<8x8xi32, #tpu.memory_space<vmem>>, vector<8x1xi32>
    %c0_7 = arith.constant 0 : index
    %c2_8 = arith.constant 2 : index
    %27 = vector.load %arg2[%c0_7, %c2_8] : memref<8x8xi32, #tpu.memory_space<vmem>>, vector<8x1xi32>
    %28 = vector.broadcast %26 : vector<8x1xi32> to vector<8x128xi32>
    %29 = arith.cmpi eq, %0, %28 : vector<8x128xi32>
    %30 = arith.extui %29 : vector<8x128xi1> to vector<8x128xi32>
    %31 = arith.sitofp %30 : vector<8x128xi32> to vector<8x128xf32>
    %32 = arith.addf %25, %31 : vector<8x128xf32>
    %33 = vector.broadcast %27 : vector<8x1xi32> to vector<8x128xi32>
    %34 = arith.cmpi eq, %0, %33 : vector<8x128xi32>
    %35 = arith.extui %34 : vector<8x128xi1> to vector<8x128xi32>
    %36 = arith.sitofp %35 : vector<8x128xi32> to vector<8x128xf32>
    %37 = arith.addf %32, %36 : vector<8x128xf32>
    %c0_9 = arith.constant 0 : index
    %c3 = arith.constant 3 : index
    %38 = vector.load %arg1[%c0_9, %c3] : memref<8x8xi32, #tpu.memory_space<vmem>>, vector<8x1xi32>
    %c0_10 = arith.constant 0 : index
    %c3_11 = arith.constant 3 : index
    %39 = vector.load %arg2[%c0_10, %c3_11] : memref<8x8xi32, #tpu.memory_space<vmem>>, vector<8x1xi32>
    %40 = vector.broadcast %38 : vector<8x1xi32> to vector<8x128xi32>
    %41 = arith.cmpi eq, %0, %40 : vector<8x128xi32>
    %42 = arith.extui %41 : vector<8x128xi1> to vector<8x128xi32>
    %43 = arith.sitofp %42 : vector<8x128xi32> to vector<8x128xf32>
    %44 = arith.addf %37, %43 : vector<8x128xf32>
    %45 = vector.broadcast %39 : vector<8x1xi32> to vector<8x128xi32>
    %46 = arith.cmpi eq, %0, %45 : vector<8x128xi32>
    %47 = arith.extui %46 : vector<8x128xi1> to vector<8x128xi32>
    %48 = arith.sitofp %47 : vector<8x128xi32> to vector<8x128xf32>
    %49 = arith.addf %44, %48 : vector<8x128xf32>
    %c0_12 = arith.constant 0 : index
    %c4 = arith.constant 4 : index
    %50 = vector.load %arg1[%c0_12, %c4] : memref<8x8xi32, #tpu.memory_space<vmem>>, vector<8x1xi32>
    %c0_13 = arith.constant 0 : index
    %c4_14 = arith.constant 4 : index
    %51 = vector.load %arg2[%c0_13, %c4_14] : memref<8x8xi32, #tpu.memory_space<vmem>>, vector<8x1xi32>
    %52 = vector.broadcast %50 : vector<8x1xi32> to vector<8x128xi32>
    %53 = arith.cmpi eq, %0, %52 : vector<8x128xi32>
    %54 = arith.extui %53 : vector<8x128xi1> to vector<8x128xi32>
    %55 = arith.sitofp %54 : vector<8x128xi32> to vector<8x128xf32>
    %56 = arith.addf %49, %55 : vector<8x128xf32>
    %57 = vector.broadcast %51 : vector<8x1xi32> to vector<8x128xi32>
    %58 = arith.cmpi eq, %0, %57 : vector<8x128xi32>
    %59 = arith.extui %58 : vector<8x128xi1> to vector<8x128xi32>
    %60 = arith.sitofp %59 : vector<8x128xi32> to vector<8x128xf32>
    %61 = arith.addf %56, %60 : vector<8x128xf32>
    %c0_15 = arith.constant 0 : index
    %c5 = arith.constant 5 : index
    %62 = vector.load %arg1[%c0_15, %c5] : memref<8x8xi32, #tpu.memory_space<vmem>>, vector<8x1xi32>
    %c0_16 = arith.constant 0 : index
    %c5_17 = arith.constant 5 : index
    %63 = vector.load %arg2[%c0_16, %c5_17] : memref<8x8xi32, #tpu.memory_space<vmem>>, vector<8x1xi32>
    %64 = vector.broadcast %62 : vector<8x1xi32> to vector<8x128xi32>
    %65 = arith.cmpi eq, %0, %64 : vector<8x128xi32>
    %66 = arith.extui %65 : vector<8x128xi1> to vector<8x128xi32>
    %67 = arith.sitofp %66 : vector<8x128xi32> to vector<8x128xf32>
    %68 = arith.addf %61, %67 : vector<8x128xf32>
    %69 = vector.broadcast %63 : vector<8x1xi32> to vector<8x128xi32>
    %70 = arith.cmpi eq, %0, %69 : vector<8x128xi32>
    %71 = arith.extui %70 : vector<8x128xi1> to vector<8x128xi32>
    %72 = arith.sitofp %71 : vector<8x128xi32> to vector<8x128xf32>
    %73 = arith.addf %68, %72 : vector<8x128xf32>
    %c0_18 = arith.constant 0 : index
    %c6 = arith.constant 6 : index
    %74 = vector.load %arg1[%c0_18, %c6] : memref<8x8xi32, #tpu.memory_space<vmem>>, vector<8x1xi32>
    %c0_19 = arith.constant 0 : index
    %c6_20 = arith.constant 6 : index
    %75 = vector.load %arg2[%c0_19, %c6_20] : memref<8x8xi32, #tpu.memory_space<vmem>>, vector<8x1xi32>
    %76 = vector.broadcast %74 : vector<8x1xi32> to vector<8x128xi32>
    %77 = arith.cmpi eq, %0, %76 : vector<8x128xi32>
    %78 = arith.extui %77 : vector<8x128xi1> to vector<8x128xi32>
    %79 = arith.sitofp %78 : vector<8x128xi32> to vector<8x128xf32>
    %80 = arith.addf %73, %79 : vector<8x128xf32>
    %81 = vector.broadcast %75 : vector<8x1xi32> to vector<8x128xi32>
    %82 = arith.cmpi eq, %0, %81 : vector<8x128xi32>
    %83 = arith.extui %82 : vector<8x128xi1> to vector<8x128xi32>
    %84 = arith.sitofp %83 : vector<8x128xi32> to vector<8x128xf32>
    %85 = arith.addf %80, %84 : vector<8x128xf32>
    %c0_21 = arith.constant 0 : index
    %c7 = arith.constant 7 : index
    %86 = vector.load %arg1[%c0_21, %c7] : memref<8x8xi32, #tpu.memory_space<vmem>>, vector<8x1xi32>
    %c0_22 = arith.constant 0 : index
    %c7_23 = arith.constant 7 : index
    %87 = vector.load %arg2[%c0_22, %c7_23] : memref<8x8xi32, #tpu.memory_space<vmem>>, vector<8x1xi32>
    %88 = vector.broadcast %86 : vector<8x1xi32> to vector<8x128xi32>
    %89 = arith.cmpi eq, %0, %88 : vector<8x128xi32>
    %90 = arith.extui %89 : vector<8x128xi1> to vector<8x128xi32>
    %91 = arith.sitofp %90 : vector<8x128xi32> to vector<8x128xf32>
    %92 = arith.addf %85, %91 : vector<8x128xf32>
    %93 = vector.broadcast %87 : vector<8x1xi32> to vector<8x128xi32>
    %94 = arith.cmpi eq, %0, %93 : vector<8x128xi32>
    %95 = arith.extui %94 : vector<8x128xi1> to vector<8x128xi32>
    %96 = arith.sitofp %95 : vector<8x128xi32> to vector<8x128xf32>
    %97 = arith.addf %92, %96 : vector<8x128xf32>
    %cst_24 = arith.constant 1.250000e-01 : f32
    %98 = vector.broadcast %cst_24 : f32 to vector<8x128xf32>
    %99 = arith.mulf %97, %98 : vector<8x128xf32>
    %100 = arith.truncf %99 : vector<8x128xf32> to vector<8x128xbf16>
    %c0_25 = arith.constant 0 : index
    %c0_26 = arith.constant 0 : index
    %101 = vector.load %arg3[%c0_25, %c0_26] : memref<128x128xbf16, #tpu.memory_space<vmem>>, vector<128x128xbf16>
    %cst_27 = arith.constant dense<0.000000e+00> : vector<8x128xf32>
    %102 = tpu.matmul %100, %101, %cst_27 {dimension_numbers = #tpu.dot_dimension_numbers<[1], [0], [0], [1], [0, 0, 1, 1], [], []>} : vector<8x128xbf16>, vector<128x128xbf16>, vector<8x128xf32> -> vector<8x128xf32>
    %103 = arith.truncf %102 : vector<8x128xf32> to vector<8x128xbf16>
    %c0_28 = arith.constant 0 : index
    %c0_29 = arith.constant 0 : index
    %104 = vector.load %arg4[%c0_28, %c0_29] : memref<128x128xbf16, #tpu.memory_space<vmem>>, vector<128x128xbf16>
    %cst_30 = arith.constant dense<0.000000e+00> : vector<8x128xf32>
    %105 = tpu.matmul %103, %104, %cst_30 {dimension_numbers = #tpu.dot_dimension_numbers<[1], [0], [0], [1], [0, 0, 1, 1], [], []>} : vector<8x128xbf16>, vector<128x128xbf16>, vector<8x128xf32> -> vector<8x128xf32>
    %c0_31 = arith.constant 0 : index
    %c0_32 = arith.constant 0 : index
    %106 = vector.load %arg5[%c0_31, %c0_32] : memref<1x128xf32, #tpu.memory_space<vmem>>, vector<1x128xf32>
    %107 = vector.broadcast %106 : vector<1x128xf32> to vector<8x128xf32>
    %108 = arith.addf %105, %107 : vector<8x128xf32>
    %109 = math.tanh %108 : vector<8x128xf32>
    %110 = arith.truncf %109 : vector<8x128xf32> to vector<8x128xbf16>
    %c0_33 = arith.constant 0 : index
    %c0_34 = arith.constant 0 : index
    %111 = vector.load %arg6[%c0_33, %c0_34] : memref<128x128xbf16, #tpu.memory_space<vmem>>, vector<128x128xbf16>
    %cst_35 = arith.constant dense<0.000000e+00> : vector<8x128xf32>
    %112 = tpu.matmul %110, %111, %cst_35 {dimension_numbers = #tpu.dot_dimension_numbers<[1], [0], [0], [1], [0, 0, 1, 1], [], []>} : vector<8x128xbf16>, vector<128x128xbf16>, vector<8x128xf32> -> vector<8x128xf32>
    %c0_36 = arith.constant 0 : index
    %c0_37 = arith.constant 0 : index
    %113 = vector.load %arg7[%c0_36, %c0_37] : memref<1x128xf32, #tpu.memory_space<vmem>>, vector<1x128xf32>
    %114 = vector.broadcast %113 : vector<1x128xf32> to vector<8x128xf32>
    %115 = arith.addf %112, %114 : vector<8x128xf32>
    %c0_38 = arith.constant 0 : index
    %c0_39 = arith.constant 0 : index
    %116 = vector.load %arg8[%c0_38, %c0_39] : memref<8x128xf32, #tpu.memory_space<vmem>>, vector<8x128xf32>
    tpu.vector_store %arg8[%c0_38, %c0_39], %115 {strides = array<i32>} : memref<8x128xf32, #tpu.memory_space<vmem>>, vector<8x128xf32>,
    return
  }
  func.func @transform_0(%arg0: i32) -> (i32, i32) {
    %c0_i32 = arith.constant 0 : i32
    %c0_i32_0 = arith.constant 0 : i32
    return %arg0, %c0_i32 : i32, i32
  }
  func.func @transform_1(%arg0: i32) -> (i32, i32) {
    %c0_i32 = arith.constant 0 : i32
    %c0_i32_0 = arith.constant 0 : i32
    return %arg0, %c0_i32 : i32, i32
  }
  func.func @transform_2(%arg0: i32) -> (i32, i32) {
    %c0_i32 = arith.constant 0 : i32
    %c0_i32_0 = arith.constant 0 : i32
    %c0_i32_1 = arith.constant 0 : i32
    return %c0_i32, %c0_i32_0 : i32, i32
  }
  func.func @transform_3(%arg0: i32) -> (i32, i32) {
    %c0_i32 = arith.constant 0 : i32
    %c0_i32_0 = arith.constant 0 : i32
    %c0_i32_1 = arith.constant 0 : i32
    return %c0_i32, %c0_i32_0 : i32, i32
  }
  func.func @transform_4(%arg0: i32) -> (i32, i32) {
    %c0_i32 = arith.constant 0 : i32
    %c0_i32_0 = arith.constant 0 : i32
    %c0_i32_1 = arith.constant 0 : i32
    return %c0_i32, %c0_i32_0 : i32, i32
  }
  func.func @transform_5(%arg0: i32) -> (i32, i32) {
    %c0_i32 = arith.constant 0 : i32
    %c0_i32_0 = arith.constant 0 : i32
    %c0_i32_1 = arith.constant 0 : i32
    return %c0_i32, %c0_i32_0 : i32, i32
  }
  func.func @transform_6(%arg0: i32) -> (i32, i32) {
    %c0_i32 = arith.constant 0 : i32
    %c0_i32_0 = arith.constant 0 : i32
    %c0_i32_1 = arith.constant 0 : i32
    return %c0_i32, %c0_i32_0 : i32, i32
  }
  func.func @transform_7(%arg0: i32) -> (i32, i32) {
    %c0_i32 = arith.constant 0 : i32
    %c0_i32_0 = arith.constant 0 : i32
    return %arg0, %c0_i32 : i32, i32
  }
}

</mosaic_0001>

<bundles_post_ra>
// kernel: tpu_custom_call.1
= control target key start
LH: loop header
LB: loop body
LE: loop exit
PB: predicated region body
PF: predicated region fallthrough
CT: control target
= control target key end

     0   :  { %12 = vsyncpa [#allocation3], 0  ;;  %s1584_s0 = inlined_call_operand.vmem [shape: s32[16,8], index: 0, kind: input, shape index: {}]   ;;  %s1585_s1 = inlined_call_operand.vmem [shape: s32[16,8], index: 1, kind: input, shape index: {}]   ;;  %s1586_s2 = inlined_call_operand.hbm [shape: bf16[128,128], index: 2, kind: input, shape index: {}]   ;;  %s1587_s3 = inlined_call_operand.hbm [shape: bf16[128,128], index: 3, kind: input, shape index: {}]   ;;  %s1588_s4 = inlined_call_operand.vmem [shape: f32[1,128], index: 4, kind: input, shape index: {}]   ;;  %s1589_s5 = inlined_call_operand.vmem [shape: bf16[128,128], index: 5, kind: input, shape index: {}]   ;;  %s1590_s6 = inlined_call_operand.vmem [shape: f32[1,128], index: 6, kind: input, shape index: {}]   ;;  %s1591_s7 = inlined_call_operand.hbm [shape: f32[16,128], index: 7, kind: output, shape index: {}]  }
   0x1   :  { %13 = vsyncpa [#allocation6], 0 }
   0x2   :  { %14 = vsyncpa [#allocation4], 0 }
   0x3   :  { %16 = vsyncpa [#allocation4 + $0x1], 0  ;;  %s1315_s24 = smov 0   ;;  %s1317_s25 = smov 0  }
   0x4   :  { %s1319_s26 = smov 0   ;;  %s1321_s27 = smov 0  }
   0x5 LB: > { %s1336_s28 = sadd.s32 4294967295, %s1258_s27   ;;  %s877_s29 = sadd.s32 4294967294, %s1258_s27   ;;  %s1258_s27 = sphi %s1321_s27, %s1611_s27   ;;  %s1254_s26 = sphi %s1319_s26, %s1610_s26   ;;  %s1250_s25 = sphi %s1317_s25, %s1609_s25   ;;  %s1246_s24 = sphi %s1315_s24, %s1608_s24  }
   0x6   : > { %s1340_s30 = sadd.s32 1, %s1258_s27   ;;  %s186_s8 = sadd.s32 1, %s1254_s26 }
   0x7   : > { %s183_s9 = ssub.s32 %s1258_s27, %s1340_s30  ;;  %p196_p0 = scmp.ne.s32.totalorder %s1254_s26, %s1250_s25 }
   0x8   : > { %p184_p1 = scmp.eq.s32.totalorder %s183_s9, 0  ;;  %p197_p2 = scmp.eq.s32.totalorder %s1336_s28, 1 }
   0x9   : > { %p202_p3 = scmp.ne.s32.totalorder %s1250_s25, %s1246_s24  ;;  %p203_p4 = scmp.eq.s32.totalorder %s877_s29, 1 }
   0xa   : > { %s1351_s10 = scalar_select %p184_p1, %s1254_s26, %s186_s8  }
   0xb   : > { %p1353_p5 = por %p197_p2, %p196_p0  ;;  %p1357_p6 = por %p203_p4, %p202_p3 }
   0xc   : > { %1595 = sst [smem:[#allocation11_spill]] %s1351_s10  ;;  %p878_p7 = scmp.ge.s32.totalorder %s1258_s27, 1 }
   0xd   : > { %s1596_s11 = scalar_select %p1353_p5, 1, 0 }
   0xe   : > { %s1597_s12 = scalar_select %p1357_p6, 1, 0 }
   0xf   : > { %p210_p8 = scmp.lt.s32.totalorder %s1258_s27, 3  ;;  %p1592_p9 = scmp.eq.s32.totalorder %s1336_s28, 0 }
  0x10   : > { %s1260_s14 = smov [#allocation2]   ;;  %s1261_s17 = smov [#allocation5]  }
  0x11   : > { %p1364_p10 = pnand %p878_p7, %p210_p8  ;;  %s222_s15 = sshll.u32 %s1260_s14, 4  ;;  %s223_s15 = int_to_ptr.vmem [resolvable:$true] %s222_s15 }
  0x12   : > { %s235_s18 = sshll.u32 %s1261_s17, 4  ;;  %s1132_s21 = scalar_lea.hbm %s1586_s2, 1024  ;;  %s1376_s18 = int_to_ptr.vmem [resolvable:$true] %s235_s18 }
  0x13   : > { %s1598_s13 = scalar_select %p1364_p10, 1, 0 }
  0x14   : > { %p1031_p11 = pneg %p1364_p10  ;;  %p1133_p13 = scmp.ne.s32.totalorder %s1586_s2, %s1132_s21 }
  0x15   : > { %p1139_p3 = scmp.lt.u32.totalorder %s1132_s21, %s1586_s2 }
  0x16   : > { %p1372_p12 = pnand %p1592_p9, %p1031_p11 }
  0x18   : > { %p1134_p0 = pneg %p1372_p12 }
  0x1a   : > { %p1135_p1 = pnand %p1134_p0, %p1133_p13 }
  0x1c   : > { %p1136_p2 = pneg %p1135_p1 }
  0x1e   : > { %p1141_p4 = pnand %p1139_p3, %p1136_p2 }
  0x20   : > { %1144 = shalt.err (!%p1141_p4)
}
  0x21   : > { %s1145_s9 = scalar_lea.vmem %s223_s15, 1024  ;;  %p1153_p9 = scmp.lt.s32.totalorder %s223_s15, %s223_s15 }
  0x22   : > { %p1146_p7 = scmp.ne.s32.totalorder %s223_s15, %s1145_s9  ;;  %p1154_p6 = scmp.lt.s32.totalorder %s1145_s9, %s1145_s9 }
  0x24   : > { %p1148_p8 = pnand %p1146_p7, %p1134_p0  ;;  %p1155_p5 = por %p1154_p6, %p1153_p9 }
  0x26   : > { %p1149_p11 = pneg %p1148_p8 }
  0x28   : > { %p1156_p10 = pnand %p1155_p5, %p1149_p11 }
  0x2a   : > { %1159 = shalt.err (!%p1156_p10)
}
  0x2b   : > { %s1262_s14 = smov 64   ;;  %s1263_s17 = smov 4  }
  0x2c   : > { %1034 = dma.hbm_to_vmem [thread:$0]  (!%p1372_p12), %s1586_s2, 1024, %s223_s15, [#allocation3], %s1262_s14, %s1262_s14, %s1263_s17  }
  0x2d   : > { %s1160_s23 = scalar_lea.hbm %s1587_s3, 1024 }
  0x2e   : > { %p1161_p13 = scmp.ne.s32.totalorder %s1587_s3, %s1160_s23  ;;  %p1167_p9 = scmp.lt.u32.totalorder %s1160_s23, %s1587_s3 }
  0x30   : > { %p1163_p5 = pnand %p1161_p13, %p1134_p0 }
  0x32   : > { %p1164_p6 = pneg %p1163_p5 }
  0x34   : > { %p1169_p10 = pnand %p1167_p9, %p1164_p6 }
  0x36   : > { %1172 = shalt.err (!%p1169_p10)
}
  0x37   : > { %s1173_s15 = scalar_lea.vmem %s1376_s18, 1024  ;;  %p1181_p4 = scmp.lt.s32.totalorder %s1376_s18, %s1376_s18 }
  0x38   : > { %p1174_p1 = scmp.ne.s32.totalorder %s1376_s18, %s1173_s15  ;;  %p1182_p7 = scmp.lt.s32.totalorder %s1173_s15, %s1173_s15 }
  0x3a   : > { %p1176_p2 = pnand %p1174_p1, %p1134_p0  ;;  %p1183_p8 = por %p1182_p7, %p1181_p4 }
  0x3c   : > { %p1177_p3 = pneg %p1176_p2 }
  0x3e   : > { %p1184_p11 = pnand %p1183_p8, %p1177_p3 }
  0x40   : > { %1187 = shalt.err (!%p1184_p11)
}
  0x41   : > { %1037 = dma.hbm_to_vmem [thread:$0]  (!%p1372_p12), %s1587_s3, 1024, %s1376_s18, [#allocation6], %s1262_s14, %s1262_s14, %s1263_s17  }
  0x42   : > { %p1600_p13 = scmp.ne.s32.totalorder %s1598_s13, 0 }
  0x43   : > { %p1601_p5 = scmp.eq.s32.totalorder (!%p1600_p13), %s1336_s28, 0 }
  0x44   : > { %274 = sbr.rel (%p1600_p13) target bundleno = 934 (0x3a6), region = 48 }
  0x4b   : > { %1233 = dma.done.wait (%p1601_p5), [#allocation3], 1024   ;;  %p1602_p0 = pmov %p1601_p5 }
  0x4d   : > { %1235 = vsyncadd (%p1602_p0), [#allocation3], 4294966272  ;;  %p1603_p6 = pmov %p1602_p0 }
  0x4e   : > { %p1604_p9 = pmov %p1602_p0 }
  0x4f   : > { %1237 = dma.done.wait (%p1603_p6), [#allocation6], 1024  }
  0x50   : > { %1239 = vsyncadd (%p1604_p9), [#allocation6], 4294966272  ;;  %p313_p10 = scmp.lt.s32.totalorder %s1336_s28, 1  ;;  %v1264_v0 = vmov 1   ;;  %v1265_v1 = vmov 0   ;;  %v1266_v2 = vmov 0.0   ;;  %v322_v26 = vlaneseq }
  0x51   : > { %1094 = vset.pattern.permute.xlu1 %v1264_v0  ;;  %1093 = vset.pattern.permute.xlu0 %v1265_v1  ;;  %v1267_v5 = vmov 2   ;;  %v1268_v6 = vmov 3   ;;  %v1106_v7 = vld [vmem:[#allocation2] sm:$0xff]   ;;  %v1269_v8 = vmov 4   ;;  %v1270_v9 = vmov 5   ;;  %v1107_v10 = vld [vmem:[#allocation2 + $0x8] sm:$0xff]  }
  0x52   : > { %s314_s13 = scalar_select %p313_p10, %s1336_s28, 1  ;;  %961 = vmatprep.subr.bf16.mxu0 %v1266_v2  ;;  %981 = vmatprep.subr.bf16.mxu1 %v1266_v2  ;;  %v1271_v11 = vmov 6   ;;  %v1108_v12 = vld [vmem:[#allocation2 + $0x10] sm:$0xff]   ;;  %v1109_v13 = vld [vmem:[#allocation2 + $0x18] sm:$0xff]   ;;  %v1272_v14 = vmov 7   ;;  %v1110_v15 = vld [vmem:[#allocation2 + $0x20] sm:$0xff]  }
  0x53   : > { %962 = vmatpush3.bf16.msra.mxu0 %v1106_v7  ;;  %v1111_v16 = vld [vmem:[#allocation2 + $0x28] sm:$0xff]   ;;  %v1112_v17 = vld [vmem:[#allocation2 + $0x30] sm:$0xff]   ;;  %v1113_v18 = vld [vmem:[#allocation2 + $0x38] sm:$0xff]   ;;  %vm1273_vm0 = vmmov 0   ;;  %v1464_v27 = vand.u32 127, %v322_v26  ;;  %s310_s9 = sand.u32 1, %s1250_s25  }
  0x54   : > { %s886_s16 = sshll.u32 %s314_s13, 3  ;;  %963 = vmatprep.subr.bf16.mxu0 %v1266_v2  ;;  %977 = vmatprep.mubr.msk.bf16.mxu0 %vm1273_vm0, %v1266_v2  ;;  %v1114_v19 = vld [vmem:[#allocation5] sm:$0xff]   ;;  %v1115_v20 = vld [vmem:[#allocation5 + $0x8] sm:$0xff]   ;;  %v1116_v21 = vld [vmem:[#allocation5 + $0x10] sm:$0xff]   ;;  %s885_s15 = sshll.u32 %s310_s9, 3 }
  0x55   : > { %s316_s17 = scalar_lea.vmem %s1584_s0, %s886_s16  ;;  %s320_s22 = scalar_lea.vmem %s1585_s1, %s886_s16  ;;  %997 = vmatprep.mubr.msk.bf16.mxu1 %vm1273_vm0, %v1266_v2  ;;  %982 = vmatpush3.bf16.msra.mxu1 %v1114_v19  ;;  %v1117_v22 = vld [vmem:[#allocation5 + $0x18] sm:$0xff]   ;;  %v1118_v23 = vld [vmem:[#allocation5 + $0x20] sm:$0xff]   ;;  %v1119_v24 = vld [vmem:[#allocation5 + $0x28] sm:$0xff]  }
  0x56   : > { %v324_v3 = vld [vmem:[%s316_s17] sm:$0xff]  ;;  %983 = vmatprep.subr.bf16.mxu1 %v1266_v2  ;;  %v1128_v26 = vld [vmem:[%s1589_s5 + $0x30] sm:$0xff]   ;;  %s931_s13 = sshll.u32 %s1336_s28, 7  ;;  %s312_s16 = scalar_lea.vmem [#allocation7], %s885_s15 }
  0x57   : > { %v325_v4 = vld [vmem:[%s320_s22] sm:$0xff]  ;;  %341 = vperm.xlu1 %1094, %v324_v3   ;;  %327 = vperm.xlu0 %1093, %v324_v3   ;;  %s784_s18 = sshll.u32 %s312_s16, 4  ;;  %s1542_s20 = scalar_lea.hbm %s1591_s7, %s931_s13  ;;  %s1544_s18 = int_to_ptr.vmem [resolvable:$true] %s784_s18 }
  0x58   : > { %964 = vmatpush3.bf16.msra.mxu0 %v1107_v10  ;;  %v1120_v25 = vld [vmem:[#allocation5 + $0x30] sm:$0xff]   ;;  %s771_s21 = scalar_lea.sflag [#allocation4], %s310_s9  ;;  %s1188_s28 = scalar_lea.vmem %s1544_s18, 128 }
  0x59   : > { %965 = vmatprep.subr.bf16.mxu0 %v1266_v2  ;;  %984 = vmatpush3.bf16.msra.mxu1 %v1115_v20  ;;  %p1189_p12 = scmp.ne.s32.totalorder %s1544_s18, %s1188_s28  ;;  %p1605_p1 = scmp.ne.s32.totalorder %s1596_s11, 0 }
  0x5a   : > { %985 = vmatprep.subr.bf16.mxu1 %v1266_v2  ;;  %s1274_s22 = smov [#allocation7]  }
  0x5b   : > { %348 = vperm.xlu1 %1094, %v325_v4   ;;  %334 = vperm.xlu0 %1093, %v325_v4   ;;  %p1190_p2 = pnand %p1189_p12, %p1605_p1  ;;  %s1192_s23 = sshll.u32 %s1274_s22, 4  ;;  %s1193_s23 = int_to_ptr.vmem [resolvable:$false] %s1192_s23 }
  0x5c   : > { %966 = vmatpush3.bf16.msra.mxu0 %v1108_v12  ;;  %s1194_s29 = scalar_lea.vmem %s1193_s23, 256  ;;  %p1195_p4 = scmp.lt.s32.totalorder %s1544_s18, %s1193_s23 }
  0x5d   : > { %967 = vmatprep.subr.bf16.mxu0 %v1266_v2  ;;  %986 = vmatpush3.bf16.msra.mxu1 %v1116_v21  ;;  %p1191_p3 = pneg %p1190_p2  ;;  %p1196_p7 = scmp.lt.s32.totalorder %s1194_s29, %s1188_s28 }
  0x5e   : > { %987 = vmatprep.subr.bf16.mxu1 %v1266_v2 }
  0x5f   : > { %1096 = vset.pattern.permute.xlu1 %v1267_v5  ;;  %1095 = vset.pattern.permute.xlu0 %v1267_v5  ;;  %p1197_p8 = por %p1196_p7, %p1195_p4 }
  0x60   : > { %362 = vperm.xlu1 %1096, %v325_v4   ;;  %355 = vperm.xlu0 %1095, %v324_v3  }
  0x61   : > { %968 = vmatpush3.bf16.msra.mxu0 %v1109_v13  ;;  %988 = vmatpush3.bf16.msra.mxu1 %v1117_v22  ;;  %p1198_p11 = pnand %p1197_p8, %p1191_p3 }
  0x62   : > { %969 = vmatprep.subr.bf16.mxu0 %v1266_v2  ;;  %989 = vmatprep.subr.bf16.mxu1 %v1266_v2 }
  0x64   : > { %1097 = vset.pattern.permute.xlu1 %v1268_v6  ;;  %1098 = vset.pattern.permute.xlu0 %v1268_v6 }
  0x65   : > { %369 = vperm.xlu1 %1097, %v324_v3   ;;  %376 = vperm.xlu0 %1098, %v325_v4  }
  0x66   : > { %970 = vmatpush3.bf16.msra.mxu0 %v1110_v15  ;;  %990 = vmatpush3.bf16.msra.mxu1 %v1118_v23  ;;  %v1122_v15 = vld [vmem:[%s1589_s5] sm:$0xff]  }
  0x67   : > { %971 = vmatprep.subr.bf16.mxu0 %v1266_v2  ;;  %991 = vmatprep.subr.bf16.mxu1 %v1266_v2 }
  0x69   : > { %1099 = vset.pattern.permute.xlu1 %v1269_v8  ;;  %1100 = vset.pattern.permute.xlu0 %v1270_v9 }
  0x6a   : > { %383 = vperm.xlu1 %1099, %v324_v3   ;;  %397 = vperm.xlu0 %1100, %v324_v3  }
  0x6b   : > { %972 = vmatpush3.bf16.msra.mxu0 %v1111_v16  ;;  %992 = vmatpush3.bf16.msra.mxu1 %v1119_v24  ;;  %v1123_v16 = vld [vmem:[%s1589_s5 + $0x8] sm:$0xff]   ;;  %v1126_v24 = vld [vmem:[%s1589_s5 + $0x20] sm:$0xff]  }
  0x6c   : > { %973 = vmatprep.subr.bf16.mxu0 %v1266_v2  ;;  %993 = vmatprep.subr.bf16.mxu1 %v1266_v2 }
  0x6e   : > { %390 = vperm.xlu1 %1099, %v325_v4   ;;  %1103 = vset.pattern.permute.xlu0 %v1271_v11 }
  0x6f   : > { %418 = vperm.xlu0 %1103, %v325_v4   ;;  %974 = vmatpush3.bf16.msra.mxu0 %v1112_v17  ;;  %v1124_v17 = vld [vmem:[%s1589_s5 + $0x10] sm:$0xff]  }
  0x70   : > { %975 = vmatprep.subr.bf16.mxu0 %v1266_v2  ;;  %994 = vmatpush3.bf16.msra.mxu1 %v1120_v25  ;;  %v1127_v25 = vld [vmem:[%s1589_s5 + $0x28] sm:$0xff]  }
  0x71   : > { %995 = vmatprep.subr.bf16.mxu1 %v1266_v2 }
  0x72   : > { %1101 = vset.pattern.permute.xlu1 %v1270_v9 }
  0x73   : > { %404 = vperm.xlu1 %1101, %v325_v4   ;;  %1105 = vset.pattern.permute.xlu0 %v1272_v14 }
  0x74   : > { %976 = vmatpush3.bf16.msra.mxu0 %v1113_v18  ;;  %v1125_v18 = vld [vmem:[%s1589_s5 + $0x18] sm:$0xff]  }
  0x75   : > { %1001 = vmatprep.subr.bf16.mxu0 %v1266_v2 }
  0x77   : > { %1102 = vset.pattern.permute.xlu1 %v1271_v11 }
  0x78   : > { %411 = vperm.xlu1 %1102, %v324_v3  }
  0x7c   : > { %1104 = vset.pattern.permute.xlu1 %v1272_v14  ;;  %v1121_v14 = vld [vmem:[#allocation5 + $0x38] sm:$0xff]  }
  0x7d   : > { %425 = vperm.xlu1 %1104, %v324_v3   ;;  %996 = vmatpush3.bf16.msra.mxu1 %v1121_v14 }
  0x81   : > { %432 = vperm.xlu1 %1104, %v325_v4  }
  0xd6   : > { %v342_v28 = vpop.permute.xlu1 %341  ;;  %v328_v29 = vpop.permute.xlu0 %327 }
  0xd7   : > { %vm329_vm1 = vcmp.eq.s32.totalorder %v1464_v27, %v328_v29  ;;  %vm343_vm2 = vcmp.eq.s32.totalorder %v1464_v27, %v342_v28  ;;  %v912_v28 = vld [vmem:[%s1588_s4] ss:$0 sm:$0xff] }
  0xd8   : > { %v888_v30 = vsel %vm329_vm1, 1.0, %v1266_v2  ;;  %v890_v35 = vsel %vm343_vm2, 1.0, %v1266_v2 }
  0xda   : > { %v349_v31 = vpop.permute.xlu1 %348  ;;  %v335_v32 = vpop.permute.xlu0 %334 }
  0xdb   : > { %vm336_vm3 = vcmp.eq.s32.totalorder %v1464_v27, %v335_v32  ;;  %vm350_vm4 = vcmp.eq.s32.totalorder %v1464_v27, %v349_v31 }
  0xdc   : > { %v889_v33 = vsel %vm336_vm3, 1.0, %v1266_v2  ;;  %v891_v39 = vsel %vm350_vm4, 1.0, %v1266_v2 }
  0xdd   : > { %v339_v34 = vadd.f32 %v889_v33, %v888_v30 }
  0xdf   : > { %v346_v36 = vadd.f32 %v890_v35, %v339_v34  ;;  %v363_v37 = vpop.permute.xlu1 %362  ;;  %v356_v38 = vpop.permute.xlu0 %355 }
  0xe0   : > { %vm357_vm5 = vcmp.eq.s32.totalorder %v1464_v27, %v356_v38  ;;  %vm364_vm6 = vcmp.eq.s32.totalorder %v1464_v27, %v363_v37 }
  0xe1   : > { %v353_v40 = vadd.f32 %v891_v39, %v346_v36  ;;  %v892_v41 = vsel %vm357_vm5, 1.0, %v1266_v2  ;;  %v893_v43 = vsel %vm364_vm6, 1.0, %v1266_v2 }
  0xe3   : > { %v360_v42 = vadd.f32 %v892_v41, %v353_v40 }
  0xe4   : > { %v370_v44 = vpop.permute.xlu1 %369  ;;  %v377_v45 = vpop.permute.xlu0 %376 }
  0xe5   : > { %v367_v46 = vadd.f32 %v893_v43, %v360_v42  ;;  %vm371_vm7 = vcmp.eq.s32.totalorder %v1464_v27, %v370_v44  ;;  %vm378_vm8 = vcmp.eq.s32.totalorder %v1464_v27, %v377_v45 }
  0xe6   : > { %v894_v47 = vsel %vm371_vm7, 1.0, %v1266_v2  ;;  %v895_v49 = vsel %vm378_vm8, 1.0, %v1266_v2 }
  0xe7   : > { %v374_v48 = vadd.f32 %v894_v47, %v367_v46 }
  0xe9   : > { %v384_v50 = vpop.permute.xlu1 %383  ;;  %v381_v51 = vadd.f32 %v895_v49, %v374_v48  ;;  %v398_v53 = vpop.permute.xlu0 %397 }
  0xea   : > { %vm385_vm9 = vcmp.eq.s32.totalorder %v1464_v27, %v384_v50  ;;  %vm399_vm11 = vcmp.eq.s32.totalorder %v1464_v27, %v398_v53 }
  0xeb   : > { %v896_v52 = vsel %vm385_vm9, 1.0, %v1266_v2  ;;  %v898_v58 = vsel %vm399_vm11, 1.0, %v1266_v2 }
  0xec   : > { %v388_v55 = vadd.f32 %v896_v52, %v381_v51 }
  0xed   : > { %v391_v54 = vpop.permute.xlu1 %390 }
  0xee   : > { %vm392_vm10 = vcmp.eq.s32.totalorder %v1464_v27, %v391_v54  ;;  %v419_v61 = vpop.permute.xlu0 %418 }
  0xef   : > { %v897_v56 = vsel %vm392_vm10, 1.0, %v1266_v2  ;;  %vm420_vm13 = vcmp.eq.s32.totalorder %v1464_v27, %v419_v61 }
  0xf0   : > { %v395_v57 = vadd.f32 %v897_v56, %v388_v55  ;;  %v901_v4 = vsel %vm420_vm13, 1.0, %v1266_v2 }
  0xf2   : > { %v405_v59 = vpop.permute.xlu1 %404  ;;  %v402_v60 = vadd.f32 %v898_v58, %v395_v57 }
  0xf3   : > { %vm406_vm12 = vcmp.eq.s32.totalorder %v1464_v27, %v405_v59 }
  0xf4   : > { %v899_v62 = vsel %vm406_vm12, 1.0, %v1266_v2 }
  0xf5   : > { %v409_v0 = vadd.f32 %v899_v62, %v402_v60 }
  0xf7   : > { %v412_v63 = vpop.permute.xlu1 %411 }
  0xf8   : > { %vm413_vm14 = vcmp.eq.s32.totalorder %v1464_v27, %v412_v63 }
  0xf9   : > { %v900_v1 = vsel %vm413_vm14, 1.0, %v1266_v2 }
  0xfa   : > { %v416_v3 = vadd.f32 %v900_v1, %v409_v0 }
  0xfc   : > { %v426_v5 = vpop.permute.xlu1 %425  ;;  %v423_v6 = vadd.f32 %v901_v4, %v416_v3 }
  0xfd   : > { %vm427_vm15 = vcmp.eq.s32.totalorder %v1464_v27, %v426_v5 }
  0xfe   : > { %v902_v7 = vsel %vm427_vm15, 1.0, %v1266_v2 }
  0xff   : > { %v430_v9 = vadd.f32 %v902_v7, %v423_v6 }
 0x100   : > { %v433_v8 = vpop.permute.xlu1 %432 }
 0x101   : > { %vm434_vm1 = vcmp.eq.s32.totalorder %v1464_v27, %v433_v8  ;;  %v1129_v27 = vld [vmem:[%s1589_s5 + $0x38] sm:$0xff]  }
 0x102   : > { %v903_v10 = vsel %vm434_vm1, 1.0, %v1266_v2 }
 0x103   : > { %v437_v11 = vadd.f32 %v903_v10, %v430_v9 }
 0x105   : > { %v438_v12 = vmul.f32 0.125, %v437_v11 }
 0x107   : > { %v439_v13 = vpack.c.bf16 %v438_v12, %v438_v12 }
 0x109   : > { %978 = vmatmul.mubr.bf16.vlgmr.msra.gmra.mrb[0].mxu0 %v439_v13 }
 0x10a   : > { %1017 = vmatprep.mubr.msk.bf16.mxu0 %vm1273_vm0, %v1266_v2  ;;  %1002 = vmatpush3.bf16.msra.mxu0 %v1122_v15 }
 0x10b   : > { %1003 = vmatprep.subr.bf16.mxu0 %v1266_v2 }
 0x10e   : > { %1004 = vmatpush3.bf16.msra.mxu0 %v1123_v16 }
 0x10f   : > { %1005 = vmatprep.subr.bf16.mxu0 %v1266_v2 }
 0x112   : > { %1006 = vmatpush3.bf16.msra.mxu0 %v1124_v17 }
 0x113   : > { %1007 = vmatprep.subr.bf16.mxu0 %v1266_v2 }
 0x116   : > { %1008 = vmatpush3.bf16.msra.mxu0 %v1125_v18 }
 0x117   : > { %1009 = vmatprep.subr.bf16.mxu0 %v1266_v2 }
 0x11a   : > { %1010 = vmatpush3.bf16.msra.mxu0 %v1126_v24 }
 0x11b   : > { %1011 = vmatprep.subr.bf16.mxu0 %v1266_v2 }
 0x11e   : > { %1012 = vmatpush3.bf16.msra.mxu0 %v1127_v25 }
 0x11f   : > { %1013 = vmatprep.subr.bf16.mxu0 %v1266_v2 }
 0x122   : > { %1014 = vmatpush3.bf16.msra.mxu0 %v1128_v26 }
 0x123   : > { %1015 = vmatprep.subr.bf16.mxu0 %v1266_v2  ;;  %v921_v2 = vld [vmem:[%s1590_s6] ss:$0 sm:$0xff] }
 0x126   : > { %1016 = vmatpush3.bf16.msra.mxu0 %v1129_v27 }
 0x1dc   : > { %v538_v19 = vpop.f32.mrb[0].mxu0 }
 0x1dd   : > { %v544_v20 = vpack.c.bf16 %v538_v19, %v538_v19  ;;  %v979_v21 = vpop.f32.mrb[1].mxu0 }
 0x1de   : > { %v541_v22 = vpop.f32.mrb[2].mxu0 }
 0x1df   : > { %v980_v23 = vpop.f32.mrb[3].mxu0  ;;  %998 = vmatmul.mubr.bf16.vlgmr.msra.gmra.mrb[0].mxu1 %v544_v20 }
 0x2b2   : > { %v650_v29 = vpop.f32.mrb[0].mxu1 }
 0x2b3   : > { %v651_v30 = vadd.f32 %v912_v28, %v650_v29  ;;  %v999_v31 = vpop.f32.mrb[1].mxu1 }
 0x2b4   : > { %v653_v32 = vpop.f32.mrb[2].mxu1 }
 0x2b5   : > { %1130 = vtanh.f32 %v651_v30  ;;  %v1000_v33 = vpop.f32.mrb[3].mxu1 }
 0x2bf   : > { %v1131_v34 = vpop.eup %1130 }
 0x2c0   : > { %v657_v35 = vpack.c.bf16 %v1131_v34, %v1131_v34 }
 0x2c2   : > { %1018 = vmatmul.mubr.bf16.vlgmr.msra.gmra.mrb[4].mxu0 %v657_v35 }
 0x395   : > { %v763_v36 = vpop.f32.mrb[4].mxu0 }
 0x396   : > { %v764_v37 = vadd.f32 %v921_v2, %v763_v36  ;;  %v1019_v38 = vpop.f32.mrb[5].mxu0 }
 0x397   : > { %v766_v39 = vpop.f32.mrb[6].mxu0 }
 0x398   : > { %769 = vst [vmem:[%s312_s16] sm:$0xff] %v764_v37  ;;  %v1020_v40 = vpop.f32.mrb[7].mxu0 }
 0x399   : > { %1201 = shalt.err (!%p1198_p11)
}
 0x39a   : > { %s1202_s8 = scalar_lea.hbm %s1542_s20, 128  ;;  %s1206_s10 = scalar_lea.hbm %s1591_s7, 256 }
 0x39b   : > { %p1203_p13 = scmp.ne.s32.totalorder %s1542_s20, %s1202_s8  ;;  %p1207_p6 = scmp.lt.u32.totalorder %s1542_s20, %s1591_s7 }
 0x39c   : > { %p1208_p9 = scmp.lt.u32.totalorder %s1206_s10, %s1202_s8  ;;  %p1210_p12 = scmp.lt.u32.totalorder %s1202_s8, %s1542_s20 }
 0x39d   : > { %p1204_p5 = pnand %p1203_p13, %p1605_p1 }
 0x39e   : > { %p1209_p10 = por %p1208_p9, %p1207_p6 }
 0x39f   : > { %p1205_p0 = pneg %p1204_p5 }
 0x3a0   : > { %p1211_p2 = por %p1210_p12, %p1209_p10 }
 0x3a2   : > { %p1212_p3 = pnand %p1211_p2, %p1205_p0 }
 0x3a4   : > { %1215 = shalt.err (!%p1212_p3)
}
 0x3a5   : > { %1029 = dma.vmem_to_hbm [thread:$0]  (%p1605_p1), %s1544_s18, 128, %s1542_s20, %s771_s21  }
 0x3a6 PF: > { %p1046_p4 = scmp.ge.s32.totalorder %s1258_s27, 2  ;;  %s796_s16 = sand.u32 1, %s1246_s24  }
 0x3a7   : > { %p1606_p7 = scmp.ne.s32.totalorder %s1597_s12, 0  ;;  %s797_s14 = scalar_lea.sflag [#allocation4], %s796_s16 }
 0x3a9   : > { %p1039_p8 = pnand %p1046_p4, %p1606_p7 }
 0x3ab   : > { %1241 = dma.done.wait (!%p1039_p8), %s797_s14, 128  }
 0x3ac   : > { %1243 = vsyncadd (!%p1039_p8), %s797_s14, 4294967168  ;;  %s1607_s17 = sld [smem:[#allocation11_spill]]  ;;  %p19_p11 = scmp.ge.s32.totalorder %s1340_s30, 4  }
 0x3ad   : > { %s1608_s24 = smov %s1250_s25  ;;  %s1609_s25 = smov %s1254_s26 }
 0x3ae   : > { %s1611_s27 = smov %s1340_s30  ;;  %21 = sbr.rel (!%p19_p11) target bundleno = 5 (0x5), region = 95 }
 0x3b2   : > { %s1610_s26 = smov %s1607_s17 }
 0x3b5   :  { %802 = vsyncpa [#allocation3], 1 }
 0x3b6   :  { %804 = vsyncpa [#allocation3 + $0x1], 1 }
 0x3b7   :  { %805 = vsyncpa [#allocation6], 1 }
 0x3b8   :  { %806 = vsyncpa [#allocation4], 1 }
 0x3b9   :  { %808 = vsyncpa [#allocation4 + $0x1], 1 }

</bundles_post_ra>
